<compile_context>
chip_gen: v7x
topology: tpu7x:2x2x1
jax: 0.10.0
libtpu: 0.0.40
codegen_flags: <defaults>
</compile_context>

<pallas_src>
import functools

import jax
import jax.numpy as jnp
import numpy as np
from jax import lax
from jax.experimental import pallas as pl
from jax.experimental.pallas import tpu as pltpu

_LANE = 128
_MAX_TK = 131072                        # nominal cap on the K (feature) tile, in elements
_VMEM_INPUT_BUDGET = 8 * 1024 * 1024    # 2 inputs x 2 pipeline buffers of (S, tk)


def _round_up(x, m):
    return (x + m - 1) // m * m


def _pick_tk(d, s, itemsize, max_tk):
    """K-tile size + K-grid size.  Single full-extent tile if it fits the VMEM budget."""
    cap = min(int(max_tk), _VMEM_INPUT_BUDGET // (4 * s * itemsize))
    cap = max((cap // _LANE) * _LANE, _LANE)
    if d <= cap:
        return d, 1                      # full-extent block: no padding / alignment needed
    return cap, pl.cdiv(d, cap)          # lane-aligned tiles; ragged last tile masked in kernel


def _classification2_kernel(c1_ref, c2_ref, out_ref, dot_acc, n1_acc, n2_acc, *,
                            feat_dim, tk, lo, ncols, mask_last):
    """Grid = (batch, k).  Accumulate cross/norm terms over k; diagonal-average epilogue."""
    S = dot_acc.shape[0]
    k = pl.program_id(1)

    @pl.when(k == 0)
    def _init():
        dot_acc[...] = jnp.zeros_like(dot_acc)
        n1_acc[...] = jnp.zeros_like(n1_acc)
        n2_acc[...] = jnp.zeros_like(n2_acc)

    c1 = c1_ref[...]                     # (S, tk) clip1 features, lane-dense
    c2 = c2_ref[...]                     # (S, tk) clip2 features, lane-dense
    if mask_last:
        # Zero the out-of-range lanes of the ragged last K tile (DMA pad is undefined).
        col = k * tk + lax.broadcasted_iota(jnp.int32, c1.shape, 1)
        valid = col < feat_dim
        c1 = jnp.where(valid, c1, jnp.zeros_like(c1))
        c2 = jnp.where(valid, c2, jnp.zeros_like(c2))

    # dot_acc[j, i] += clip1[j] . clip2[i]  (MXU; contraction over the lane axis of both;
    # bf16 operands go to the MXU natively, accumulation stays f32).
    dot_acc[...] += lax.dot_general(
        c1, c2, (((1,), (1,)), ((), ())), preferred_element_type=jnp.float32)

    c1f = c1.astype(jnp.float32)
    c2f = c2.astype(jnp.float32)
    # ||clip1[j]||^2 as an (S, 1) column (XLU lane reduction).
    n1_acc[...] += jnp.sum(c1f * c1f, axis=1, keepdims=True)
    # ||clip2[i]||^2 directly as a (1, S) row via a ones-vector matmul (avoids a transpose).
    n2_acc[...] += lax.dot_general(
        jnp.ones((1, c2f.shape[1]), jnp.float32), c2f * c2f,
        (((1,), (1,)), ((), ())), preferred_element_type=jnp.float32)

    @pl.when(k == pl.num_programs(1) - 1)
    def _epilogue():
        # sq[j, i] = ||clip1[j] - clip2[i]||^2 ; matrix[i, j] = -(1e13 / D) * sq[j, i].
        sq = n1_acc[...] + n2_acc[...] - 2.0 * dot_acc[...]             # (S, S)

        ncols_pad = out_ref.shape[-1]
        scale = -1.0e13 / feat_dim
        # Diagonal bucket of matrix[i, j] is kd = S - 1 - i + j; we only emit buckets
        # kd = lo .. lo+ncols-1 (the module's final slice), lane-padded to ncols_pad.
        col = lax.broadcasted_iota(jnp.int32, (S, ncols_pad), 1)        # output column c
        ii = lax.broadcasted_iota(jnp.int32, (S, ncols_pad), 0)         # i (column of sq)
        kd = col + lo
        divisor = jnp.where(kd <= S - 1, kd + 1, 2 * S - 1 - kd)
        divisor = jnp.maximum(divisor, 1).astype(jnp.float32)           # clamp pad lanes
        valid_col = col < ncols

        acc = jnp.zeros((1, ncols_pad), jnp.float32)
        for j in range(S):   # static unroll: S tiny lane-dense MXU matmuls
            w_j = jnp.where((kd == (S - 1 - ii + j)) & valid_col, scale / divisor, 0.0)
            acc = acc + lax.dot_general(
                sq[j:j + 1, :], w_j, (((1,), (0,)), ((), ())),
                preferred_element_type=jnp.float32)
        out_ref[...] = acc


def _classification2_batched(c1, c2, sequence_length, max_tk):
    """c1, c2: (B, S, D) feature-flattened clips of identical dtype (f32 or bf16)."""
    B, S, D = c1.shape
    assert S == int(sequence_length)
    lo = int(S / 2 - 1)
    hi = int(S * 3 / 2)
    ncols = hi - lo
    ncols_pad = _round_up(ncols, _LANE)
    itemsize = jnp.dtype(c1.dtype).itemsize
    tk, grid_k = _pick_tk(D, S, itemsize, max_tk)
    mask_last = (grid_k > 1) and (D % tk != 0)

    kernel = functools.partial(_classification2_kernel, feat_dim=D, tk=tk,
                               lo=lo, ncols=ncols, mask_last=mask_last)
    cost = pl.CostEstimate(
        flops=B * (2 * S * S * D + 4 * S * D + 2 * S * S * ncols_pad),
        transcendentals=0,
        bytes_accessed=B * (2 * S * D * itemsize + ncols_pad * 4))

    out = pl.pallas_call(
        kernel,
        out_shape=jax.ShapeDtypeStruct((B, 1, ncols_pad), jnp.float32),
        grid_spec=pltpu.PrefetchScalarGridSpec(
            num_scalar_prefetch=0,
            grid=(B, grid_k),
            in_specs=[
                pl.BlockSpec((None, S, tk), lambda b, k: (b, 0, k)),
                pl.BlockSpec((None, S, tk), lambda b, k: (b, 0, k)),
            ],
            out_specs=pl.BlockSpec((None, 1, ncols_pad), lambda b, k: (b, 0, 0)),
            scratch_shapes=[
                pltpu.VMEM((S, S), jnp.float32),   # accumulated clip1 @ clip2^T
                pltpu.VMEM((S, 1), jnp.float32),   # accumulated ||clip1[j]||^2
                pltpu.VMEM((1, S), jnp.float32),   # accumulated ||clip2[i]||^2
            ],
        ),
        compiler_params=pltpu.CompilerParams(
            dimension_semantics=("parallel", "arbitrary")),   # batch parallel, K reduction
        cost_estimate=cost,
    )(c1, c2)
    return out[:, 0, :ncols]


def _prep(clip, batched):
    x = jnp.asarray(clip)
    if x.dtype not in (jnp.dtype(jnp.bfloat16), jnp.dtype(jnp.float32)):
        x = x.astype(jnp.float32)
    if batched:
        return x.reshape(x.shape[0], x.shape[1], -1)
    return x.reshape(x.shape[0], -1)


def classification2_forward(clip1, clip2, sequence_length, *, max_tk=_MAX_TK):
    """Pallas implementation of Classification2(sequence_length).forward(clip1, clip2)."""
    S = int(sequence_length)
    c1 = _prep(clip1, batched=False)[None]   # (1, S, D)
    c2 = _prep(clip2, batched=False)[None]
    if c1.dtype != c2.dtype:
        c1, c2 = c1.astype(jnp.float32), c2.astype(jnp.float32)
    return _classification2_batched(c1, c2, S, max_tk)[0]


def classification2_forward_batched(clips1, clips2, sequence_length, *, max_tk=_MAX_TK):
    """Batched variant over a leading axis of clip pairs (keeps both v7x TCs busy)."""
    S = int(sequence_length)
    c1 = _prep(clips1, batched=True)         # (B, S, D)
    c2 = _prep(clips2, batched=True)
    if c1.dtype != c2.dtype:
        c1, c2 = c1.astype(jnp.float32), c2.astype(jnp.float32)
    return _classification2_batched(c1, c2, S, max_tk)


def _reference(clip1, clip2, sequence_length):
    """Pure-JAX mirror of the PyTorch module (computes (a-b)^2 directly)."""
    S = int(sequence_length)
    c1 = jnp.asarray(clip1, jnp.float32).reshape(S, -1)
    c2 = jnp.asarray(clip2, jnp.float32).reshape(S, -1)
    # matrix[x, y] = mse(clip1[y], clip2[x])
    matrix = -jnp.mean((c2[:, None, :] - c1[None, :, :]) ** 2, axis=-1) * 1.0e13
    nd = 2 * S - 1
    arr = jnp.zeros((S, nd), jnp.float32)
    for i in range(S):
        arr = arr.at[i, S - 1 - i:2 * S - 1 - i].set(matrix[i, :])
    sums = arr.sum(axis=0)
    divide = jnp.concatenate(
        [jnp.arange(1, S), jnp.arange(S, 0, -1)]).astype(jnp.float32)
    res = sums / divide
    return res[int(S / 2 - 1):int(S * 3 / 2)]


if __name__ == "__main__":
    S, C, H, W = 8, 4, 16, 16              # sequence_length = 8, frames are (4, 16, 16)
    key = jax.random.PRNGKey(0)
    k1, k2, k3, k4 = jax.random.split(key, 4)
    clip1 = jax.random.normal(k1, (S, C, H, W), dtype=jnp.float32)
    clip2 = jax.random.normal(k2, (S, C, H, W), dtype=jnp.float32)

    ref = jax.block_until_ready(_reference(clip1, clip2, S))

    # Default path: single full-extent K tile (D = 1024), grid = (1, 1).
    out = jax.block_until_ready(classification2_forward(clip1, clip2, S))
    np.testing.assert_allclose(np.asarray(out), np.asarray(ref), rtol=2e-3)

    # K-tiled path with a ragged last tile (1024 = 2*384 + 256): exercises the
    # accumulator / double-buffered DMA path and the in-kernel lane mask.
    out_tiled = jax.block_until_ready(
        classification2_forward(clip1, clip2, S, max_tk=384))
    np.testing.assert_allclose(np.asarray(out_tiled), np.asarray(ref), rtol=2e-3)

    # bf16 inputs (halve HBM traffic); reference on the same rounded values.
    c1_bf = clip1.astype(jnp.bfloat16)
    c2_bf = clip2.astype(jnp.bfloat16)
    ref_bf = jax.block_until_ready(
        _reference(c1_bf.astype(jnp.float32), c2_bf.astype(jnp.float32), S))
    out_bf = jax.block_until_ready(classification2_forward(c1_bf, c2_bf, S))
    np.testing.assert_allclose(np.asarray(out_bf), np.asarray(ref_bf), rtol=5e-2)

    # Batched clip pairs: leading "parallel" grid axis (uses both v7x TensorCores).
    B = 4
    clips1 = jax.random.normal(k3, (B, S, C, H, W), dtype=jnp.float32)
    clips2 = jax.random.normal(k4, (B, S, C, H, W), dtype=jnp.float32)
    out_b = jax.block_until_ready(classification2_forward_batched(clips1, clips2, S))
    ref_b = np.stack([np.asarray(_reference(clips1[b], clips2[b], S)) for b in range(B)])
    np.testing.assert_allclose(np.asarray(out_b), ref_b, rtol=2e-3)

    print("KERNEL_OK")
</pallas_src>

<mosaic_0001>
module attributes {stable_mosaic.version = 11 : i64} {
  func.func @_classification2_kernel(%arg0: i32, %arg1: i32, %arg2: memref<1x8x1024xf32, #tpu.memory_space<vmem>>, %arg3: memref<1x8x1024xf32, #tpu.memory_space<vmem>>, %arg4: memref<1x1x128xf32, #tpu.memory_space<vmem>>, %arg5: memref<8x8xf32, #tpu.memory_space<vmem>>, %arg6: memref<8x1xf32, #tpu.memory_space<vmem>>, %arg7: memref<1x8xf32, #tpu.memory_space<vmem>>) attributes {dimension_semantics = [#tpu.dimension_semantics<parallel>, #tpu.dimension_semantics<arbitrary>], iteration_bounds = array<i64: 1, 1>, scalar_prefetch = 0 : i64, scratch_operands = 3 : i64, tpu.core_type = #tpu.core_type<tc>, window_params = [{transform_indices = @transform_0, window_bounds = array<i64: 1, 8, 1024>}, {transform_indices = @transform_1, window_bounds = array<i64: 1, 8, 1024>}, {transform_indices = @transform_2, window_bounds = array<i64: 1, 1, 128>}]} {
    %c0_i32 = arith.constant 0 : i32
    %0 = arith.cmpi eq, %arg1, %c0_i32 : i32
    %1 = arith.extui %0 : i1 to i32
    %c0_i32_0 = arith.constant 0 : i32
    %2 = arith.cmpi ne, %1, %c0_i32_0 : i32
    scf.if %2 {
      %cst_23 = arith.constant 0.000000e+00 : f32
      %26 = vector.broadcast %cst_23 : f32 to vector<8x8xf32>
      %c0_24 = arith.constant 0 : index
      %c0_25 = arith.constant 0 : index
      %27 = vector.load %arg5[%c0_24, %c0_25] : memref<8x8xf32, #tpu.memory_space<vmem>>, vector<8x8xf32>
      tpu.vector_store %arg5[%c0_24, %c0_25], %26 {strides = array<i32>} : memref<8x8xf32, #tpu.memory_space<vmem>>, vector<8x8xf32>,
      %cst_26 = arith.constant 0.000000e+00 : f32
      %28 = vector.broadcast %cst_26 : f32 to vector<8x1xf32>
      %c0_27 = arith.constant 0 : index
      %c0_28 = arith.constant 0 : index
      %29 = vector.load %arg6[%c0_27, %c0_28] : memref<8x1xf32, #tpu.memory_space<vmem>>, vector<8x1xf32>
      tpu.vector_store %arg6[%c0_27, %c0_28], %28 {strides = array<i32>} : memref<8x1xf32, #tpu.memory_space<vmem>>, vector<8x1xf32>,
      %cst_29 = arith.constant 0.000000e+00 : f32
      %30 = vector.broadcast %cst_29 : f32 to vector<1x8xf32>
      %c0_30 = arith.constant 0 : index
      %c0_31 = arith.constant 0 : index
      %31 = vector.load %arg7[%c0_30, %c0_31] : memref<1x8xf32, #tpu.memory_space<vmem>>, vector<1x8xf32>
      tpu.vector_store %arg7[%c0_30, %c0_31], %30 {strides = array<i32>} : memref<1x8xf32, #tpu.memory_space<vmem>>, vector<1x8xf32>,
    } else {
    }
    %c0 = arith.constant 0 : index
    %c0_1 = arith.constant 0 : index
    %c0_2 = arith.constant 0 : index
    %3 = vector.load %arg2[%c0, %c0_1, %c0_2] : memref<1x8x1024xf32, #tpu.memory_space<vmem>>, vector<1x8x1024xf32>
    %4 = vector.shape_cast %3 : vector<1x8x1024xf32> to vector<8x1024xf32>
    %c0_3 = arith.constant 0 : index
    %c0_4 = arith.constant 0 : index
    %c0_5 = arith.constant 0 : index
    %5 = vector.load %arg3[%c0_3, %c0_4, %c0_5] : memref<1x8x1024xf32, #tpu.memory_space<vmem>>, vector<1x8x1024xf32>
    %6 = vector.shape_cast %5 : vector<1x8x1024xf32> to vector<8x1024xf32>
    %c0_6 = arith.constant 0 : index
    %c0_7 = arith.constant 0 : index
    %7 = vector.load %arg5[%c0_6, %c0_7] : memref<8x8xf32, #tpu.memory_space<vmem>>, vector<8x8xf32>
    %cst = arith.constant dense<0.000000e+00> : vector<8x8xf32>
    %8 = tpu.matmul %4, %6, %cst {dimension_numbers = #tpu.dot_dimension_numbers<[1], [1], [0], [0], [0, 0, 1, 0], [], []>} : vector<8x1024xf32>, vector<8x1024xf32>, vector<8x8xf32> -> vector<8x8xf32>
    %9 = arith.addf %7, %8 : vector<8x8xf32>
    %c0_8 = arith.constant 0 : index
    %c0_9 = arith.constant 0 : index
    %10 = vector.load %arg5[%c0_8, %c0_9] : memref<8x8xf32, #tpu.memory_space<vmem>>, vector<8x8xf32>
    tpu.vector_store %arg5[%c0_8, %c0_9], %9 {strides = array<i32>} : memref<8x8xf32, #tpu.memory_space<vmem>>, vector<8x8xf32>,
    %c0_10 = arith.constant 0 : index
    %c0_11 = arith.constant 0 : index
    %11 = vector.load %arg6[%c0_10, %c0_11] : memref<8x1xf32, #tpu.memory_space<vmem>>, vector<8x1xf32>
    %12 = arith.mulf %4, %4 : vector<8x1024xf32>
    %cst_12 = arith.constant dense<0.000000e+00> : vector<8xf32>
    %13 = vector.multi_reduction <add>, %12, %cst_12 [1] : vector<8x1024xf32> to vector<8xf32>
    %14 = vector.shape_cast %13 : vector<8xf32> to vector<8x1xf32>
    %15 = arith.addf %11, %14 : vector<8x1xf32>
    %c0_13 = arith.constant 0 : index
    %c0_14 = arith.constant 0 : index
    %16 = vector.load %arg6[%c0_13, %c0_14] : memref<8x1xf32, #tpu.memory_space<vmem>>, vector<8x1xf32>
    tpu.vector_store %arg6[%c0_13, %c0_14], %15 {strides = array<i32>} : memref<8x1xf32, #tpu.memory_space<vmem>>, vector<8x1xf32>,
    %c0_15 = arith.constant 0 : index
    %c0_16 = arith.constant 0 : index
    %17 = vector.load %arg7[%c0_15, %c0_16] : memref<1x8xf32, #tpu.memory_space<vmem>>, vector<1x8xf32>
    %cst_17 = arith.constant 1.000000e+00 : f32
    %18 = vector.broadcast %cst_17 : f32 to vector<1x1024xf32>
    %19 = arith.mulf %6, %6 : vector<8x1024xf32>
    %cst_18 = arith.constant dense<0.000000e+00> : vector<1x8xf32>
    %20 = tpu.matmul %18, %19, %cst_18 {dimension_numbers = #tpu.dot_dimension_numbers<[1], [1], [0], [0], [0, 0, 1, 0], [], []>} : vector<1x1024xf32>, vector<8x1024xf32>, vector<1x8xf32> -> vector<1x8xf32>
    %21 = arith.addf %17, %20 : vector<1x8xf32>
    %c0_19 = arith.constant 0 : index
    %c0_20 = arith.constant 0 : index
    %22 = vector.load %arg7[%c0_19, %c0_20] : memref<1x8xf32, #tpu.memory_space<vmem>>, vector<1x8xf32>
    tpu.vector_store %arg7[%c0_19, %c0_20], %21 {strides = array<i32>} : memref<1x8xf32, #tpu.memory_space<vmem>>, vector<1x8xf32>,
    %c0_i32_21 = arith.constant 0 : i32
    %23 = arith.cmpi eq, %arg1, %c0_i32_21 : i32
    %24 = arith.extui %23 : i1 to i32
    %c0_i32_22 = arith.constant 0 : i32
    %25 = arith.cmpi ne, %24, %c0_i32_22 : i32
    scf.if %25 {
      %c0_23 = arith.constant 0 : index
      %c0_24 = arith.constant 0 : index
      %26 = vector.load %arg6[%c0_23, %c0_24] : memref<8x1xf32, #tpu.memory_space<vmem>>, vector<8x1xf32>
      %c0_25 = arith.constant 0 : index
      %c0_26 = arith.constant 0 : index
      %27 = vector.load %arg7[%c0_25, %c0_26] : memref<1x8xf32, #tpu.memory_space<vmem>>, vector<1x8xf32>
      %28 = vector.broadcast %26 : vector<8x1xf32> to vector<8x8xf32>
      %29 = vector.broadcast %27 : vector<1x8xf32> to vector<8x8xf32>
      %30 = arith.addf %28, %29 : vector<8x8xf32>
      %c0_27 = arith.constant 0 : index
      %c0_28 = arith.constant 0 : index
      %31 = vector.load %arg5[%c0_27, %c0_28] : memref<8x8xf32, #tpu.memory_space<vmem>>, vector<8x8xf32>
      %cst_29 = arith.constant 2.000000e+00 : f32
      %32 = vector.broadcast %cst_29 : f32 to vector<8x8xf32>
      %33 = arith.mulf %32, %31 : vector<8x8xf32>
      %34 = arith.subf %30, %33 : vector<8x8xf32>
      %35 = tpu.iota {dimensions = array<i32: 1>} : vector<8x128xi32>
      %36 = tpu.iota {dimensions = array<i32: 0>} : vector<8x128xi32>
      %c3_i32 = arith.constant 3 : i32
      %37 = vector.broadcast %c3_i32 : i32 to vector<8x128xi32>
      %38 = arith.addi %35, %37 : vector<8x128xi32>
      %c7_i32 = arith.constant 7 : i32
      %39 = vector.broadcast %c7_i32 : i32 to vector<8x128xi32>
      %40 = arith.cmpi sle, %38, %39 : vector<8x128xi32>
      %c1_i32 = arith.constant 1 : i32
      %41 = vector.broadcast %c1_i32 : i32 to vector<8x128xi32>
      %42 = arith.addi %38, %41 : vector<8x128xi32>
      %c15_i32 = arith.constant 15 : i32
      %43 = vector.broadcast %c15_i32 : i32 to vector<8x128xi32>
      %44 = arith.subi %43, %38 : vector<8x128xi32>
      %45 = arith.select %40, %42, %44 : vector<8x128xi1>, vector<8x128xi32>
      %c1_i32_30 = arith.constant 1 : i32
      %46 = vector.broadcast %c1_i32_30 : i32 to vector<8x128xi32>
      %47 = arith.maxsi %45, %46 : vector<8x128xi32>
      %48 = arith.sitofp %47 : vector<8x128xi32> to vector<8x128xf32>
      %c9_i32 = arith.constant 9 : i32
      %49 = vector.broadcast %c9_i32 : i32 to vector<8x128xi32>
      %50 = arith.cmpi slt, %35, %49 : vector<8x128xi32>
      %cst_31 = arith.constant 0.000000e+00 : f32
      %51 = vector.broadcast %cst_31 : f32 to vector<1x128xf32>
      %c7_i32_32 = arith.constant 7 : i32
      %52 = vector.broadcast %c7_i32_32 : i32 to vector<8x128xi32>
      %53 = arith.subi %52, %36 : vector<8x128xi32>
      %c0_i32_33 = arith.constant 0 : i32
      %54 = vector.broadcast %c0_i32_33 : i32 to vector<8x128xi32>
      %55 = arith.addi %53, %54 : vector<8x128xi32>
      %56 = arith.cmpi eq, %38, %55 : vector<8x128xi32>
      %57 = arith.andi %56, %50 : vector<8x128xi1>
      %cst_34 = arith.constant -9.76562483E+9 : f32
      %58 = vector.broadcast %cst_34 : f32 to vector<8x128xf32>
      %59 = arith.divf %58, %48 : vector<8x128xf32>
      %cst_35 = arith.constant 0.000000e+00 : f32
      %60 = vector.broadcast %cst_35 : f32 to vector<8x128xf32>
      %61 = arith.select %57, %59, %60 : vector<8x128xi1>, vector<8x128xf32>
      %62 = vector.extract_strided_slice %34 {offsets = [0, 0], sizes = [1, 8], strides = [1, 1]} : vector<8x8xf32> to vector<1x8xf32>
      %cst_36 = arith.constant dense<0.000000e+00> : vector<1x128xf32>
      %63 = tpu.matmul %62, %61, %cst_36 {dimension_numbers = #tpu.dot_dimension_numbers<[1], [0], [0], [1], [0, 0, 1, 1], [], []>} : vector<1x8xf32>, vector<8x128xf32>, vector<1x128xf32> -> vector<1x128xf32>
      %64 = arith.addf %51, %63 : vector<1x128xf32>
      %c7_i32_37 = arith.constant 7 : i32
      %65 = vector.broadcast %c7_i32_37 : i32 to vector<8x128xi32>
      %66 = arith.subi %65, %36 : vector<8x128xi32>
      %c1_i32_38 = arith.constant 1 : i32
      %67 = vector.broadcast %c1_i32_38 : i32 to vector<8x128xi32>
      %68 = arith.addi %66, %67 : vector<8x128xi32>
      %69 = arith.cmpi eq, %38, %68 : vector<8x128xi32>
      %70 = arith.andi %69, %50 : vector<8x128xi1>
      %cst_39 = arith.constant -9.76562483E+9 : f32
      %71 = vector.broadcast %cst_39 : f32 to vector<8x128xf32>
      %72 = arith.divf %71, %48 : vector<8x128xf32>
      %cst_40 = arith.constant 0.000000e+00 : f32
      %73 = vector.broadcast %cst_40 : f32 to vector<8x128xf32>
      %74 = arith.select %70, %72, %73 : vector<8x128xi1>, vector<8x128xf32>
      %75 = vector.extract_strided_slice %34 {offsets = [1, 0], sizes = [1, 8], strides = [1, 1]} : vector<8x8xf32> to vector<1x8xf32>
      %cst_41 = arith.constant dense<0.000000e+00> : vector<1x128xf32>
      %76 = tpu.matmul %75, %74, %cst_41 {dimension_numbers = #tpu.dot_dimension_numbers<[1], [0], [0], [1], [0, 0, 1, 1], [], []>} : vector<1x8xf32>, vector<8x128xf32>, vector<1x128xf32> -> vector<1x128xf32>
      %77 = arith.addf %64, %76 : vector<1x128xf32>
      %c7_i32_42 = arith.constant 7 : i32
      %78 = vector.broadcast %c7_i32_42 : i32 to vector<8x128xi32>
      %79 = arith.subi %78, %36 : vector<8x128xi32>
      %c2_i32 = arith.constant 2 : i32
      %80 = vector.broadcast %c2_i32 : i32 to vector<8x128xi32>
      %81 = arith.addi %79, %80 : vector<8x128xi32>
      %82 = arith.cmpi eq, %38, %81 : vector<8x128xi32>
      %83 = arith.andi %82, %50 : vector<8x128xi1>
      %cst_43 = arith.constant -9.76562483E+9 : f32
      %84 = vector.broadcast %cst_43 : f32 to vector<8x128xf32>
      %85 = arith.divf %84, %48 : vector<8x128xf32>
      %cst_44 = arith.constant 0.000000e+00 : f32
      %86 = vector.broadcast %cst_44 : f32 to vector<8x128xf32>
      %87 = arith.select %83, %85, %86 : vector<8x128xi1>, vector<8x128xf32>
      %88 = vector.extract_strided_slice %34 {offsets = [2, 0], sizes = [1, 8], strides = [1, 1]} : vector<8x8xf32> to vector<1x8xf32>
      %cst_45 = arith.constant dense<0.000000e+00> : vector<1x128xf32>
      %89 = tpu.matmul %88, %87, %cst_45 {dimension_numbers = #tpu.dot_dimension_numbers<[1], [0], [0], [1], [0, 0, 1, 1], [], []>} : vector<1x8xf32>, vector<8x128xf32>, vector<1x128xf32> -> vector<1x128xf32>
      %90 = arith.addf %77, %89 : vector<1x128xf32>
      %c7_i32_46 = arith.constant 7 : i32
      %91 = vector.broadcast %c7_i32_46 : i32 to vector<8x128xi32>
      %92 = arith.subi %91, %36 : vector<8x128xi32>
      %c3_i32_47 = arith.constant 3 : i32
      %93 = vector.broadcast %c3_i32_47 : i32 to vector<8x128xi32>
      %94 = arith.addi %92, %93 : vector<8x128xi32>
      %95 = arith.cmpi eq, %38, %94 : vector<8x128xi32>
      %96 = arith.andi %95, %50 : vector<8x128xi1>
      %cst_48 = arith.constant -9.76562483E+9 : f32
      %97 = vector.broadcast %cst_48 : f32 to vector<8x128xf32>
      %98 = arith.divf %97, %48 : vector<8x128xf32>
      %cst_49 = arith.constant 0.000000e+00 : f32
      %99 = vector.broadcast %cst_49 : f32 to vector<8x128xf32>
      %100 = arith.select %96, %98, %99 : vector<8x128xi1>, vector<8x128xf32>
      %101 = vector.extract_strided_slice %34 {offsets = [3, 0], sizes = [1, 8], strides = [1, 1]} : vector<8x8xf32> to vector<1x8xf32>
      %cst_50 = arith.constant dense<0.000000e+00> : vector<1x128xf32>
      %102 = tpu.matmul %101, %100, %cst_50 {dimension_numbers = #tpu.dot_dimension_numbers<[1], [0], [0], [1], [0, 0, 1, 1], [], []>} : vector<1x8xf32>, vector<8x128xf32>, vector<1x128xf32> -> vector<1x128xf32>
      %103 = arith.addf %90, %102 : vector<1x128xf32>
      %c7_i32_51 = arith.constant 7 : i32
      %104 = vector.broadcast %c7_i32_51 : i32 to vector<8x128xi32>
      %105 = arith.subi %104, %36 : vector<8x128xi32>
      %c4_i32 = arith.constant 4 : i32
      %106 = vector.broadcast %c4_i32 : i32 to vector<8x128xi32>
      %107 = arith.addi %105, %106 : vector<8x128xi32>
      %108 = arith.cmpi eq, %38, %107 : vector<8x128xi32>
      %109 = arith.andi %108, %50 : vector<8x128xi1>
      %cst_52 = arith.constant -9.76562483E+9 : f32
      %110 = vector.broadcast %cst_52 : f32 to vector<8x128xf32>
      %111 = arith.divf %110, %48 : vector<8x128xf32>
      %cst_53 = arith.constant 0.000000e+00 : f32
      %112 = vector.broadcast %cst_53 : f32 to vector<8x128xf32>
      %113 = arith.select %109, %111, %112 : vector<8x128xi1>, vector<8x128xf32>
      %114 = vector.extract_strided_slice %34 {offsets = [4, 0], sizes = [1, 8], strides = [1, 1]} : vector<8x8xf32> to vector<1x8xf32>
      %cst_54 = arith.constant dense<0.000000e+00> : vector<1x128xf32>
      %115 = tpu.matmul %114, %113, %cst_54 {dimension_numbers = #tpu.dot_dimension_numbers<[1], [0], [0], [1], [0, 0, 1, 1], [], []>} : vector<1x8xf32>, vector<8x128xf32>, vector<1x128xf32> -> vector<1x128xf32>
      %116 = arith.addf %103, %115 : vector<1x128xf32>
      %c7_i32_55 = arith.constant 7 : i32
      %117 = vector.broadcast %c7_i32_55 : i32 to vector<8x128xi32>
      %118 = arith.subi %117, %36 : vector<8x128xi32>
      %c5_i32 = arith.constant 5 : i32
      %119 = vector.broadcast %c5_i32 : i32 to vector<8x128xi32>
      %120 = arith.addi %118, %119 : vector<8x128xi32>
      %121 = arith.cmpi eq, %38, %120 : vector<8x128xi32>
      %122 = arith.andi %121, %50 : vector<8x128xi1>
      %cst_56 = arith.constant -9.76562483E+9 : f32
      %123 = vector.broadcast %cst_56 : f32 to vector<8x128xf32>
      %124 = arith.divf %123, %48 : vector<8x128xf32>
      %cst_57 = arith.constant 0.000000e+00 : f32
      %125 = vector.broadcast %cst_57 : f32 to vector<8x128xf32>
      %126 = arith.select %122, %124, %125 : vector<8x128xi1>, vector<8x128xf32>
      %127 = vector.extract_strided_slice %34 {offsets = [5, 0], sizes = [1, 8], strides = [1, 1]} : vector<8x8xf32> to vector<1x8xf32>
      %cst_58 = arith.constant dense<0.000000e+00> : vector<1x128xf32>
      %128 = tpu.matmul %127, %126, %cst_58 {dimension_numbers = #tpu.dot_dimension_numbers<[1], [0], [0], [1], [0, 0, 1, 1], [], []>} : vector<1x8xf32>, vector<8x128xf32>, vector<1x128xf32> -> vector<1x128xf32>
      %129 = arith.addf %116, %128 : vector<1x128xf32>
      %c7_i32_59 = arith.constant 7 : i32
      %130 = vector.broadcast %c7_i32_59 : i32 to vector<8x128xi32>
      %131 = arith.subi %130, %36 : vector<8x128xi32>
      %c6_i32 = arith.constant 6 : i32
      %132 = vector.broadcast %c6_i32 : i32 to vector<8x128xi32>
      %133 = arith.addi %131, %132 : vector<8x128xi32>
      %134 = arith.cmpi eq, %38, %133 : vector<8x128xi32>
      %135 = arith.andi %134, %50 : vector<8x128xi1>
      %cst_60 = arith.constant -9.76562483E+9 : f32
      %136 = vector.broadcast %cst_60 : f32 to vector<8x128xf32>
      %137 = arith.divf %136, %48 : vector<8x128xf32>
      %cst_61 = arith.constant 0.000000e+00 : f32
      %138 = vector.broadcast %cst_61 : f32 to vector<8x128xf32>
      %139 = arith.select %135, %137, %138 : vector<8x128xi1>, vector<8x128xf32>
      %140 = vector.extract_strided_slice %34 {offsets = [6, 0], sizes = [1, 8], strides = [1, 1]} : vector<8x8xf32> to vector<1x8xf32>
      %cst_62 = arith.constant dense<0.000000e+00> : vector<1x128xf32>
      %141 = tpu.matmul %140, %139, %cst_62 {dimension_numbers = #tpu.dot_dimension_numbers<[1], [0], [0], [1], [0, 0, 1, 1], [], []>} : vector<1x8xf32>, vector<8x128xf32>, vector<1x128xf32> -> vector<1x128xf32>
      %142 = arith.addf %129, %141 : vector<1x128xf32>
      %c7_i32_63 = arith.constant 7 : i32
      %143 = vector.broadcast %c7_i32_63 : i32 to vector<8x128xi32>
      %144 = arith.subi %143, %36 : vector<8x128xi32>
      %c7_i32_64 = arith.constant 7 : i32
      %145 = vector.broadcast %c7_i32_64 : i32 to vector<8x128xi32>
      %146 = arith.addi %144, %145 : vector<8x128xi32>
      %147 = arith.cmpi eq, %38, %146 : vector<8x128xi32>
      %148 = arith.andi %147, %50 : vector<8x128xi1>
      %cst_65 = arith.constant -9.76562483E+9 : f32
      %149 = vector.broadcast %cst_65 : f32 to vector<8x128xf32>
      %150 = arith.divf %149, %48 : vector<8x128xf32>
      %cst_66 = arith.constant 0.000000e+00 : f32
      %151 = vector.broadcast %cst_66 : f32 to vector<8x128xf32>
      %152 = arith.select %148, %150, %151 : vector<8x128xi1>, vector<8x128xf32>
      %153 = vector.extract_strided_slice %34 {offsets = [7, 0], sizes = [1, 8], strides = [1, 1]} : vector<8x8xf32> to vector<1x8xf32>
      %cst_67 = arith.constant dense<0.000000e+00> : vector<1x128xf32>
      %154 = tpu.matmul %153, %152, %cst_67 {dimension_numbers = #tpu.dot_dimension_numbers<[1], [0], [0], [1], [0, 0, 1, 1], [], []>} : vector<1x8xf32>, vector<8x128xf32>, vector<1x128xf32> -> vector<1x128xf32>
      %155 = arith.addf %142, %154 : vector<1x128xf32>
      %c0_68 = arith.constant 0 : index
      %c0_69 = arith.constant 0 : index
      %c0_70 = arith.constant 0 : index
      %156 = vector.load %arg4[%c0_68, %c0_69, %c0_70] : memref<1x1x128xf32, #tpu.memory_space<vmem>>, vector<1x1x128xf32>
      %157 = vector.shape_cast %156 : vector<1x1x128xf32> to vector<1x128xf32>
      %158 = vector.shape_cast %155 : vector<1x128xf32> to vector<1x1x128xf32>
      tpu.vector_store %arg4[%c0_68, %c0_69, %c0_70], %158 {strides = array<i32>} : memref<1x1x128xf32, #tpu.memory_space<vmem>>, vector<1x1x128xf32>,
    } else {
    }
    return
  }
  func.func @transform_0(%arg0: i32, %arg1: i32) -> (i32, i32, i32) {
    %c0_i32 = arith.constant 0 : i32
    %c0_i32_0 = arith.constant 0 : i32
    return %arg0, %c0_i32, %arg1 : i32, i32, i32
  }
  func.func @transform_1(%arg0: i32, %arg1: i32) -> (i32, i32, i32) {
    %c0_i32 = arith.constant 0 : i32
    %c0_i32_0 = arith.constant 0 : i32
    return %arg0, %c0_i32, %arg1 : i32, i32, i32
  }
  func.func @transform_2(%arg0: i32, %arg1: i32) -> (i32, i32, i32) {
    %c0_i32 = arith.constant 0 : i32
    %c0_i32_0 = arith.constant 0 : i32
    %c0_i32_1 = arith.constant 0 : i32
    return %arg0, %c0_i32, %c0_i32_0 : i32, i32, i32
  }
}

</mosaic_0001>

<bundles_post_ra>
// kernel: tpu_custom_call.1
= control target key start
LH: loop header
LB: loop body
LE: loop exit
PB: predicated region body
PF: predicated region fallthrough
CT: control target
= control target key end

     0   :  { %7 = vsyncpa [#allocation6], 0  ;;  %s1661_s0 = inlined_call_operand.hbm [shape: f32[1,8,1024], index: 0, kind: input, shape index: {}]   ;;  %s1662_s1 = inlined_call_operand.hbm [shape: f32[1,8,1024], index: 1, kind: input, shape index: {}]   ;;  %s1663_s2 = inlined_call_operand.hbm [shape: f32[1,1,128], index: 2, kind: output, shape index: {}]  }
   0x1   :  { %8 = vsyncpa [#allocation9], 0 }
   0x2   :  { %9 = vsyncpa [#allocation7], 0  ;;  %s1502_s9 = smov [#allocation5]   ;;  %s1503_s11 = smov [#allocation8]  }
   0x3   :  { %s16_s10 = sshll.u32 %s1502_s9, 4  ;;  %s26_s12 = sshll.u32 %s1503_s11, 4  ;;  %s17_s10 = int_to_ptr.vmem [resolvable:$true] %s16_s10  ;;  %s27_s12 = int_to_ptr.vmem [resolvable:$true] %s26_s12 }
   0x4   :  { %s1430_s15 = scalar_lea.hbm %s1661_s0, 1024 }
   0x5   :  { %p1431_p0 = scmp.ne.s32.totalorder %s1661_s0, %s1430_s15  ;;  %p1434_p1 = scmp.lt.u32.totalorder %s1430_s15, %s1661_s0 }
   0x7   :  { %p1436_p2 = pnand %p1434_p1, %p1431_p0 }
   0x9   :  { %1439 = shalt.err (!%p1436_p2)
}
   0xa   :  { %s1440_s20 = scalar_lea.vmem %s17_s10, 1024  ;;  %p1445_p4 = scmp.lt.s32.totalorder %s17_s10, %s17_s10 }
   0xb   :  { %p1441_p3 = scmp.ne.s32.totalorder %s17_s10, %s1440_s20  ;;  %p1446_p5 = scmp.lt.s32.totalorder %s1440_s20, %s1440_s20 }
   0xd   :  { %p1447_p6 = por %p1446_p5, %p1445_p4 }
   0xf   :  { %p1448_p7 = pnand %p1447_p6, %p1441_p3 }
  0x11   :  { %1451 = shalt.err (!%p1448_p7)
}
  0x12   :  { %19 = dma.hbm_to_vmem [thread:$0]  %s1661_s0, 1024, %s17_s10, [#allocation6]  }
  0x13   :  { %s1452_s25 = scalar_lea.hbm %s1662_s1, 1024 }
  0x14   :  { %p1453_p8 = scmp.ne.s32.totalorder %s1662_s1, %s1452_s25  ;;  %p1456_p9 = scmp.lt.u32.totalorder %s1452_s25, %s1662_s1 }
  0x16   :  { %p1458_p10 = pnand %p1456_p9, %p1453_p8 }
  0x18   :  { %1461 = shalt.err (!%p1458_p10)
}
  0x19   :  { %s1462_s30 = scalar_lea.vmem %s27_s12, 1024  ;;  %p1467_p12 = scmp.lt.s32.totalorder %s27_s12, %s27_s12 }
  0x1a   :  { %p1463_p11 = scmp.ne.s32.totalorder %s27_s12, %s1462_s30  ;;  %p1468_p13 = scmp.lt.s32.totalorder %s1462_s30, %s1462_s30 }
  0x1c   :  { %p1469_p0 = por %p1468_p13, %p1467_p12 }
  0x1e   :  { %p1470_p1 = pnand %p1469_p0, %p1463_p11 }
  0x20   :  { %1473 = shalt.err (!%p1470_p1)
}
  0x21   :  { %29 = dma.hbm_to_vmem [thread:$0]  %s1662_s1, 1024, %s27_s12, [#allocation9]  }
  0x22   :  { %1496 = dma.done.wait [#allocation6], 1024  }
  0x23   :  { %1497 = vsyncadd [#allocation6], 4294966272 }
  0x24   :  { %1498 = dma.done.wait [#allocation9], 1024  }
  0x25   :  { %1499 = vsyncadd [#allocation9], 4294966272  ;;  %vm42_vm0 = vcmask 7168   ;;  %v1504_v0 = vmov 0.0   ;;  %v46_v1 = vld [vmem:[#allocation5] sm:$0xff]  ;;  %v47_v2 = vld [vmem:[#allocation5 + $0x8] sm:$0xff]  ;;  %v679_v42 = vlaneseq }
  0x26   :  { %43 = vst.msk [vmem:[#allocation3] sm:$0xff] %vm42_vm0, %v1504_v0  ;;  %1366 = vmatprep.subr.mxu0 %v1504_v0  ;;  %v48_v3 = vld [vmem:[#allocation5 + $0x10] sm:$0xff]  ;;  %v49_v4 = vld [vmem:[#allocation5 + $0x18] sm:$0xff]  ;;  %v347_v5 = vmul.f32 %v46_v1, %v46_v1  ;;  %v348_v6 = vmul.f32 %v47_v2, %v47_v2  ;;  %127 = vmatprep.mubr.f32.mxu1 %v47_v2  ;;  %v50_v8 = vld [vmem:[#allocation5 + $0x20] sm:$0xff]  ;;  %v1505_v36 = vmov 1.0   ;;  %v1506_v41 = vmov 0  }
  0x27   :  { %v349_v7 = vmul.f32 %v48_v3, %v48_v3  ;;  %v55_v9 = vld [vmem:[#allocation8 + $0x8] sm:$0xff]  ;;  %v350_v10 = vmul.f32 %v49_v4, %v49_v4  ;;  %v54_v12 = vld [vmem:[#allocation8] sm:$0xff]  ;;  %v57_v13 = vld [vmem:[#allocation8 + $0x18] sm:$0xff]  ;;  %v351_v15 = vmul.f32 %v50_v8, %v50_v8  ;;  %1427 = vset.pattern.permute.xlu0 %v1506_v41  ;;  %vm40_vm1 = vcmask 64512   ;;  %s1508_s1 = smov [#allocation10]  }
  0x28   :  { %v355_v11 = vadd.f32 %v348_v6, %v347_v5  ;;  %63 = vmatprep.subr.mxu1 %v55_v9  ;;  %v51_v14 = vld [vmem:[#allocation5 + $0x28] sm:$0xff]  ;;  %v56_v17 = vld [vmem:[#allocation8 + $0x10] sm:$0xff]  ;;  %v53_v22 = vld [vmem:[#allocation5 + $0x38] sm:$0xff]  ;;  %v369_v30 = vmul.f32 %v55_v9, %v55_v9  ;;  %v368_v33 = vmul.f32 %v54_v12, %v54_v12  ;;  %v371_v34 = vmul.f32 %v57_v13, %v57_v13  ;;  %s1323_s4 = sshll.u32 %s1508_s1, 4  ;;  %s1324_s4 = int_to_ptr.vmem [resolvable:$true] %s1323_s4 }
  0x29   :  { %64 = vmatpush1.xpose.msra.mxu1 %v54_v12  ;;  %v52_v18 = vld [vmem:[#allocation5 + $0x30] sm:$0xff]  ;;  %v59_v19 = vld [vmem:[#allocation8 + $0x28] sm:$0xff]  ;;  %v352_v20 = vmul.f32 %v51_v14, %v51_v14  ;;  %v58_v25 = vld [vmem:[#allocation8 + $0x20] sm:$0xff]  ;;  %v354_v27 = vmul.f32 %v53_v22, %v53_v22  ;;  %v370_v35 = vmul.f32 %v56_v17, %v56_v17  ;;  %41 = vst.msk [vmem:[#allocation2] sm:$0xff] %vm40_vm1, %v1504_v0  ;;  %vm44_vm2 = vcmask 57344   ;;  %s1474_s5 = scalar_lea.vmem %s1324_s4, 16  ;;  %p1479_p3 = scmp.lt.s32.totalorder %s1324_s4, %s1324_s4 }
  0x2a   :  { %v356_v16 = vadd.f32 %v355_v11, %v349_v7  ;;  %133 = vmatprep.subr.mxu1 %v57_v13  ;;  %v353_v23 = vmul.f32 %v52_v18, %v52_v18  ;;  %v61_v26 = vld [vmem:[#allocation8 + $0x38] sm:$0xff]  ;;  %v60_v31 = vld [vmem:[#allocation8 + $0x30] sm:$0xff]  ;;  %v373_v37 = vmul.f32 %v59_v19, %v59_v19  ;;  %v372_v38 = vmul.f32 %v58_v25, %v58_v25  ;;  %p1475_p2 = scmp.ne.s32.totalorder %s1324_s4, %s1474_s5  ;;  %s1478_s6 = scalar_lea.vmem %s1324_s4, 32 }
  0x2b   :  { %v375_v39 = vmul.f32 %v61_v26, %v61_v26  ;;  %v374_v40 = vmul.f32 %v60_v31, %v60_v31  ;;  %45 = vst.msk [vmem:[#allocation4] sm:$0x1] %vm44_vm2, %v1504_v0  ;;  %v680_v43 = vand.u32 127, %v679_v42  ;;  %v682_v53 = vshrl.u32 %v679_v42, 7  ;;  %p1480_p4 = scmp.lt.s32.totalorder %s1478_s6, %s1474_s5 }
  0x2c   :  { %v357_v21 = vadd.f32 %v356_v16, %v350_v10  ;;  %128 = vmatmul.mubr.f32.vlgmr.msra.gmra.mrb[0].mxu1 %v46_v1  ;;  %vm1507_vm7 = vmmov 0  }
  0x2d   :  { %134 = vmatpush1.xpose.msra.mxu1 %v56_v17  ;;  %197 = vmatprep.mubr.f32.mxu1 %v49_v4  ;;  %v683_v44 = vadd.s32 3, %v680_v43  ;;  %v346_v47 = vld [vmem:[#allocation3] sm:$0xff]  ;;  %v692_v55 = vsub.s32 7, %v682_v53  ;;  %vm691_vm5 = vcmp.lt.s32.totalorder %v680_v43, 9  ;;  %p1481_p5 = por %p1480_p4, %p1479_p3 }
  0x2e   :  { %v358_v24 = vadd.f32 %v357_v21, %v351_v15  ;;  %203 = vmatprep.subr.mxu1 %v59_v19  ;;  %1368 = vmatprep.mubr.msk.f32.mxu0 %vm1507_vm7, %v1504_v0 }
  0x2f   :  { %v685_v45 = vadd.s32 1, %v683_v44  ;;  %v686_v46 = vsub.s32 15, %v683_v44  ;;  %vm684_vm3 = vcmp.le.s32.totalorder %v683_v44, 7  ;;  %v698_v56 = vadd.s32 1, %v692_v55  ;;  %p1482_p6 = pnand %p1481_p5, %p1475_p2 }
  0x30   :  { %v359_v28 = vadd.f32 %v358_v24, %v352_v20  ;;  %198 = vmatmul.mubr.f32.vlgmr.msra.gmra.mrb[2].mxu1 %v48_v3  ;;  %vm693_vm9 = vcmp.eq.s32.totalorder %v683_v44, %v692_v55  ;;  %v848_v60 = vadd.s32 2, %v692_v55  ;;  %v926_v62 = vadd.s32 3, %v692_v55  ;;  %v62_v17 = vld [vmem:[#allocation2] sm:$0xff] }
  0x31   :  { %204 = vmatpush1.xpose.msra.mxu1 %v58_v25  ;;  %267 = vmatprep.mubr.f32.mxu1 %v51_v14  ;;  %v687_v48 = vsel %vm684_vm3, %v685_v45, %v686_v46  ;;  %vm699_vm6 = vcmp.eq.s32.totalorder %v683_v44, %v698_v56  ;;  %vm1564_vm10 = vmand %vm693_vm9, %vm691_vm5  ;;  %v1004_v1 = vadd.s32 4, %v692_v55  ;;  %v1082_v3 = vadd.s32 5, %v692_v55 }
  0x32   :  { %v360_v29 = vadd.f32 %v359_v28, %v353_v23  ;;  %273 = vmatprep.subr.mxu1 %v61_v26  ;;  %vm688_vm4 = vcmp.gt.s32.totalorder %v687_v48, 1  ;;  %vm700_vm8 = vmand %vm699_vm6, %vm691_vm5  ;;  %vm849_vm11 = vcmp.eq.s32.totalorder %v683_v44, %v848_v60  ;;  %vm927_vm13 = vcmp.eq.s32.totalorder %v683_v44, %v926_v62 }
  0x33   :  { %v689_v50 = vsel %vm688_vm4, %v687_v48, 1  ;;  %vm1569_vm12 = vmand %vm849_vm11, %vm691_vm5  ;;  %vm1005_vm15 = vcmp.eq.s32.totalorder %v683_v44, %v1004_v1  ;;  %vm1083_vm3 = vcmp.eq.s32.totalorder %v683_v44, %v1082_v3  ;;  %v1160_v5 = vadd.s32 6, %v692_v55 }
  0x34   :  { %v361_v32 = vadd.f32 %v360_v29, %v354_v27  ;;  %268 = vmatmul.mubr.f32.vlgmr.msra.gmra.mrb[4].mxu1 %v50_v8  ;;  %v690_v52 = vcvt.s32.f32 %v689_v50  ;;  %vm1574_vm14 = vmand %vm927_vm13, %vm691_vm5  ;;  %v1238_v12 = vadd.s32 7, %v692_v55 }
  0x35   :  { %274 = vmatpush1.xpose.msra.mxu1 %v60_v31  ;;  %337 = vmatprep.mubr.f32.mxu1 %v53_v22  ;;  %vm1584_vm4 = vmand %vm1083_vm3, %vm691_vm5  ;;  %vm1161_vm6 = vcmp.eq.s32.totalorder %v683_v44, %v1160_v5 }
  0x36   :  { %362 = vadd.xlane.f32.xlu0 %v361_v32  ;;  %376 = vmatprep.subr.mxu1 %v369_v30  ;;  %1428 = vrcp.f32 %v690_v52  ;;  %vm1239_vm9 = vcmp.eq.s32.totalorder %v683_v44, %v1238_v12  ;;  %v367_v30 = vld [vmem:[#allocation4] sm:$0x1] }
  0x37   :  { %vm1594_vm11 = vmand %vm1239_vm9, %vm691_vm5 }
  0x38   :  { %338 = vmatmul.mubr.f32.vlgmr.msra.gmra.mrb[6].mxu1 %v52_v18 }
  0x39   :  { %377 = vmatpush1.xpose.msra.mxu1 %v368_v33  ;;  %440 = vmatprep.mubr.f32.mxu1 %v1505_v36 }
  0x3a   :  { %446 = vmatprep.subr.mxu1 %v371_v34 }
  0x3c   :  { %441 = vmatmul.mubr.f32.vlgmr.msra.gmra.mrb[8].mxu1 %v1505_v36 }
  0x3d   :  { %447 = vmatpush1.xpose.msra.mxu1 %v370_v35  ;;  %510 = vmatprep.mubr.f32.mxu1 %v1505_v36 }
  0x3e   :  { %516 = vmatprep.subr.mxu1 %v373_v37 }
  0x40   :  { %511 = vmatmul.mubr.f32.vlgmr.msra.gmra.mrb[10].mxu1 %v1505_v36  ;;  %v1429_v57 = vpop.eup %1428 }
  0x41   :  { %517 = vmatpush1.xpose.msra.mxu1 %v372_v38  ;;  %580 = vmatprep.mubr.f32.mxu1 %v1505_v36  ;;  %v1556_v58 = vmul.f32 -9.765625e+09, %v1429_v57 }
  0x42   :  { %586 = vmatprep.subr.mxu1 %v375_v39 }
  0x43   :  { %1367 = vmatpush3.msk.msra.mxu0 %vm700_vm8, %v1556_v58  ;;  %vm1589_vm8 = vmand %vm1161_vm6, %vm691_vm5 }
  0x44   :  { %581 = vmatmul.mubr.f32.vlgmr.msra.gmra.mrb[12].mxu1 %v1505_v36  ;;  %1371 = vmatprep.subr.mxu0 %v1504_v0 }
  0x45   :  { %587 = vmatpush1.xpose.msra.mxu1 %v374_v40  ;;  %650 = vmatprep.mubr.f32.mxu1 %v1505_v36 }
  0x48   :  { %651 = vmatmul.mubr.f32.vlgmr.msra.gmra.mrb[14].mxu1 %v1505_v36 }
  0xc3   :  { %v363_v49 = vpop.xlane.xlu0 %362 }
  0xc4   :  { %v364_v51 = vadd.f32 %v363_v49, %v346_v47 }
  0xc6   :  { %366 = vst.msk [vmem:[#allocation3] sm:$0xff] %vm42_vm0, %v364_v51  ;;  %vm1579_vm0 = vmand %vm1005_vm15, %vm691_vm5 }
  0xcd   :  { %v662_v54 = vld [vmem:[#allocation3] sm:$0xff] }
  0xce   :  { %666 = vperm.xlu0 %1427, %v662_v54  }
  0xff   :  { %v129_v6 = vpop.f32.mrb[0].mxu1 }
 0x100   :  { %v131_v8 = vpop.f32.mrb[1].mxu1 }
 0x103   :  { %v199_v9 = vpop.f32.mrb[2].mxu1 }
 0x104   :  { %v200_v10 = vadd.f32 %v199_v9, %v129_v6  ;;  %v201_v11 = vpop.f32.mrb[3].mxu1 }
 0x107   :  { %v269_v13 = vpop.f32.mrb[4].mxu1 }
 0x108   :  { %v270_v15 = vadd.f32 %v269_v13, %v200_v10  ;;  %v271_v16 = vpop.f32.mrb[5].mxu1 }
 0x10b   :  { %v339_v18 = vpop.f32.mrb[6].mxu1 }
 0x10c   :  { %v340_v19 = vadd.f32 %v339_v18, %v270_v15  ;;  %v341_v20 = vpop.f32.mrb[7].mxu1 }
 0x10e   :  { %v343_v21 = vadd.f32 %v340_v19, %v62_v17 }
 0x10f   :  { %v442_v22 = vpop.f32.mrb[8].mxu1 }
 0x110   :  { %345 = vst.msk [vmem:[#allocation2] sm:$0xff] %vm40_vm1, %v343_v21  ;;  %v444_v23 = vpop.f32.mrb[9].mxu1 }
 0x113   :  { %v512_v24 = vpop.f32.mrb[10].mxu1 }
 0x114   :  { %v513_v25 = vadd.f32 %v512_v24, %v442_v22  ;;  %v514_v26 = vpop.f32.mrb[11].mxu1 }
 0x117   :  { %v582_v27 = vpop.f32.mrb[12].mxu1  ;;  %v676_v35 = vld [vmem:[#allocation2] sm:$0xff] }
 0x118   :  { %v583_v28 = vadd.f32 %v582_v27, %v513_v25  ;;  %v584_v29 = vpop.f32.mrb[13].mxu1  ;;  %v677_v39 = vmul.f32 2.0, %v676_v35 }
 0x11b   :  { %v652_v31 = vpop.f32.mrb[14].mxu1 }
 0x11c   :  { %v653_v32 = vadd.f32 %v652_v31, %v583_v28  ;;  %v654_v33 = vpop.f32.mrb[15].mxu1 }
 0x11e   :  { %v656_v34 = vadd.f32 %v653_v32, %v367_v30 }
 0x120   :  { %658 = vst.msk [vmem:[#allocation4] sm:$0x1] %vm44_vm2, %v656_v34 }
 0x127   :  { %v1333_v36 = vld [vmem:[#allocation4] ss:$0 sm:$0xff] }
 0x14d   :  { %v667_v37 = vpop.permute.xlu0 %666 }
 0x14e   :  { %v675_v38 = vadd.f32 %v1333_v36, %v667_v37 }
 0x150   :  { %v678_v40 = vsub.f32 %v675_v38, %v677_v39 }
 0x152   :  { %v703_v41 = vrot.slane %v678_v40, 1  ;;  %v852_v42 = vrot.slane %v678_v40, 2  ;;  %v930_v43 = vrot.slane %v678_v40, 3  ;;  %v1008_v44 = vrot.slane %v678_v40, 4 }
 0x153   :  { %v1086_v45 = vrot.slane %v678_v40, 5  ;;  %v1164_v46 = vrot.slane %v678_v40, 6  ;;  %v1242_v47 = vrot.slane %v678_v40, 7 }
 0x154   :  { %1369 = vmatmul.mubr.msk.f32.vlgmr.msra.gmra.mrb[0].mxu0 %vm40_vm1, %v703_v41 }
 0x155   :  { %1372 = vmatpush3.msk.msra.mxu0 %vm1564_vm10, %v1556_v58  ;;  %1373 = vmatprep.mubr.msk.f32.mxu0 %vm1507_vm7, %v1504_v0 }
 0x156   :  { %1376 = vmatprep.subr.mxu0 %v1504_v0 }
 0x15c   :  { %1374 = vmatmul.mubr.msk.f32.vlgmr.msra.gmra.mrb[0].mxu0 %vm40_vm1, %v678_v40 }
 0x15d   :  { %1377 = vmatpush3.msk.msra.mxu0 %vm1569_vm12, %v1556_v58  ;;  %1378 = vmatprep.mubr.msk.f32.mxu0 %vm1507_vm7, %v1504_v0 }
 0x15e   :  { %1381 = vmatprep.subr.mxu0 %v1504_v0 }
 0x164   :  { %1379 = vmatmul.mubr.msk.f32.vlgmr.msra.gmra.mrb[0].mxu0 %vm40_vm1, %v852_v42 }
 0x165   :  { %1382 = vmatpush3.msk.msra.mxu0 %vm1574_vm14, %v1556_v58  ;;  %1383 = vmatprep.mubr.msk.f32.mxu0 %vm1507_vm7, %v1504_v0 }
 0x166   :  { %1386 = vmatprep.subr.mxu0 %v1504_v0 }
 0x16c   :  { %1384 = vmatmul.mubr.msk.f32.vlgmr.msra.gmra.mrb[0].mxu0 %vm40_vm1, %v930_v43 }
 0x16d   :  { %1387 = vmatpush3.msk.msra.mxu0 %vm1579_vm0, %v1556_v58  ;;  %1388 = vmatprep.mubr.msk.f32.mxu0 %vm1507_vm7, %v1504_v0 }
 0x16e   :  { %1391 = vmatprep.subr.mxu0 %v1504_v0 }
 0x174   :  { %1389 = vmatmul.mubr.msk.f32.vlgmr.msra.gmra.mrb[0].mxu0 %vm40_vm1, %v1008_v44 }
 0x175   :  { %1392 = vmatpush3.msk.msra.mxu0 %vm1584_vm4, %v1556_v58  ;;  %1393 = vmatprep.mubr.msk.f32.mxu0 %vm1507_vm7, %v1504_v0 }
 0x176   :  { %1396 = vmatprep.subr.mxu0 %v1504_v0 }
 0x17c   :  { %1394 = vmatmul.mubr.msk.f32.vlgmr.msra.gmra.mrb[0].mxu0 %vm40_vm1, %v1086_v45 }
 0x17d   :  { %1397 = vmatpush3.msk.msra.mxu0 %vm1589_vm8, %v1556_v58  ;;  %1398 = vmatprep.mubr.msk.f32.mxu0 %vm1507_vm7, %v1504_v0 }
 0x17e   :  { %1401 = vmatprep.subr.mxu0 %v1504_v0 }
 0x184   :  { %1399 = vmatmul.mubr.msk.f32.vlgmr.msra.gmra.mrb[0].mxu0 %vm40_vm1, %v1164_v46 }
 0x185   :  { %1402 = vmatpush3.msk.msra.mxu0 %vm1594_vm11, %v1556_v58  ;;  %1403 = vmatprep.mubr.msk.f32.mxu0 %vm1507_vm7, %v1504_v0 }
 0x18c   :  { %1404 = vmatmul.mubr.msk.f32.vlgmr.msra.gmra.mrb[0].mxu0 %vm40_vm1, %v1242_v47 }
 0x25f   :  { %v1311_v48 = vpop.f32.mrb[0].mxu0 }
 0x260   :  { %1316 = vst [vmem:[#allocation10] sm:$0x1] %v1311_v48  ;;  %v1405_v49 = vpop.f32.mrb[1].mxu0 }
 0x261   :  { %1485 = shalt.err (!%p1482_p6)
}
 0x262   :  { %s1486_s9 = scalar_lea.hbm %s1663_s2, 16 }
 0x263   :  { %p1487_p7 = scmp.ne.s32.totalorder %s1663_s2, %s1486_s9  ;;  %p1490_p8 = scmp.lt.u32.totalorder %s1486_s9, %s1663_s2 }
 0x265   :  { %p1492_p9 = pnand %p1490_p8, %p1487_p7 }
 0x267   :  { %1495 = shalt.err (!%p1492_p9)
}
 0x268   :  { %1326 = dma.vmem_to_hbm [thread:$0]  %s1324_s4, 16, %s1663_s2, [#allocation7]  }
 0x269   :  { %1500 = dma.done.wait [#allocation7], 16  }
 0x26a   :  { %1501 = vsyncadd [#allocation7], 4294967280 }
 0x26b   :  { %1330 = vsyncpa [#allocation6], 1 }
 0x26c   :  { %1331 = vsyncpa [#allocation9], 1 }
 0x26d   :  { %1332 = vsyncpa [#allocation7], 1 }

</bundles_post_ra>
